<compile_context>
chip_gen: v5e
topology: v5e:2x2
jax: 0.10.0
libtpu: 0.0.40
codegen_flags: <defaults>
</compile_context>

<pallas_src>
import math

import numpy as np
import jax
import jax.numpy as jnp
from jax import lax
from jax.experimental import pallas as pl
from jax.experimental.pallas import tpu as pltpu

# ---- small synthetic config ----
BATCH = 2
SEQ = 8
HIDDEN = 32
N_HEADS = 4
N_KV_HEADS = 2
HEAD_DIM = HIDDEN // N_HEADS          # 8
GROUPS = N_HEADS // N_KV_HEADS        # 2
FFN = 64                              # intermediate_size
WINDOW = 4                            # attention_window_size
ROPE_BASE = 10000.0
EPS = 1e-6
BS = BATCH * SEQ                      # 16 rows processed together


# ------------------------------------------------------------------ kernel
def _rmsnorm(v, w):
    var = jnp.mean(v * v, axis=-1, keepdims=True)
    return v * lax.rsqrt(var + EPS) * w


def decoder_kernel(x_ref, norms_ref, wqkv_ref, wogu_ref, wd_ref, cs_ref,
                   mb_ref, o_ref):
    f32, bf16 = jnp.float32, jnp.bfloat16
    H, H2 = HIDDEN, 2 * HIDDEN

    x = x_ref[...]                                            # (BS, H) f32
    n1 = norms_ref[0:1, :]                                    # (1, H)
    n2 = norms_ref[1:2, :]

    # ---- norm1 + fused projection [q*s | k | q@R*s | k@R | v] ----
    h1 = _rmsnorm(x, n1)
    qkv = jnp.dot(h1.astype(bf16), wqkv_ref[...],
                  preferred_element_type=f32)                 # (BS, 5H)

    # RoPE as one 64-lane-wide FMA (scale pre-folded into the q columns)
    cs = cs_ref[...]                                          # (BS, 4H)=[cos2|sin2]
    qk_rope = qkv[:, :H2] * cs[:, :H2] + qkv[:, H2:2 * H2] * cs[:, H2:]
    q_rope = qk_rope[:, :H]
    k_rope = qk_rope[:, H:]
    v = qkv[:, 2 * H2:]

    # ---- block-diagonal attention: heads stacked along sublanes ----
    mb = mb_ref[...]                                          # (NH*BS, H+BS)
    qmask = mb[:, :H]                                         # head block mask
    bias = mb[:, H:]                                          # causal window + batch

    q_big = jnp.tile(q_rope, (N_HEADS, 1)) * qmask            # (NH*BS, H)
    scores = lax.dot_general(q_big.astype(bf16), k_rope.astype(bf16),
                             (((1,), (1,)), ((), ())),
                             preferred_element_type=f32)      # (NH*BS, BS)
    scores = scores + bias
    m = jnp.max(scores, axis=-1, keepdims=True)
    p = jnp.exp(scores - m)
    denom = jnp.sum(p, axis=-1, keepdims=True)
    p = p * pl.reciprocal(denom, approx=True)                 # EUP, off the VALU

    ctx = jnp.dot(p.astype(bf16), v.astype(bf16),
                  preferred_element_type=f32)                 # (NH*BS, H)
    ctx = ctx * qmask                                         # keep own head lanes
    # fold stacked heads back to (BS, H): sum the tile-aligned sublane blocks
    attn = ctx[0:BS]
    for h in range(1, N_HEADS):
        attn = attn + ctx[h * BS:(h + 1) * BS]

    wogu = wogu_ref[...]                                      # (H, 2*FFN + H) bf16
    wgu = wogu[:, :2 * FFN]                                   # lane-aligned 0:128
    wo = wogu[:, 2 * FFN:]                                    # lanes 128:160

    attn = jnp.dot(attn.astype(bf16), wo, preferred_element_type=f32)
    x_mid = x + attn

    # ---- norm2 + fused SwiGLU MLP ----
    h2 = _rmsnorm(x_mid, n2)
    gu = jnp.dot(h2.astype(bf16), wgu,
                 preferred_element_type=f32)                  # (BS, 2*FFN)=(16,128)
    g = gu[:, :FFN]
    u = gu[:, FFN:]
    act = g * jax.nn.sigmoid(g) * u                           # silu(gate) * up, f32
    d = jnp.dot(act.astype(bf16), wd_ref[...],
                preferred_element_type=f32)                   # (BS, H)

    o_ref[...] = x_mid + d


def decoder_forward(x, kp):
    B, S, H = x.shape
    x_flat = x.reshape(B * S, H)

    args = (x_flat, kp["norms"], kp["wqkv"], kp["wogu"], kp["wd"],
            kp["cossin"], kp["maskbias"])

    def spec(a):
        return pl.BlockSpec(a.shape, lambda i, _nd=a.ndim: (0,) * _nd)

    flops = 2 * (BS * H * 5 * H                # qkv
                 + N_HEADS * BS * H * BS       # scores
                 + N_HEADS * BS * BS * H       # ctx
                 + BS * H * H                  # o-proj
                 + BS * H * 2 * FFN            # gate/up
                 + BS * FFN * H)               # down
    bytes_accessed = int(sum(a.size * a.dtype.itemsize for a in args)
                         + B * S * H * 4)
    ce = pl.CostEstimate(flops=flops,
                         transcendentals=N_HEADS * BS * BS + BS * FFN + 4 * BS,
                         bytes_accessed=bytes_accessed)

    out = pl.pallas_call(
        decoder_kernel,
        out_shape=jax.ShapeDtypeStruct((B * S, H), jnp.float32),
        grid=(1,),                       # whole batch in one invocation
        in_specs=[spec(a) for a in args],
        out_specs=pl.BlockSpec((B * S, H), lambda i: (0, 0)),
        compiler_params=pltpu.CompilerParams(
            # single grid step; with a real row-tile grid (v7x) mark "parallel"
            dimension_semantics=("arbitrary",)),
        cost_estimate=ce,
    )(*args)
    return out.reshape(B, S, H)


# ------------------------------------------------------------------ host-side prep
def rope_tables():
    pos = jnp.arange(SEQ, dtype=jnp.float32)
    inv_freq = 1.0 / (ROPE_BASE ** (jnp.arange(0, HEAD_DIM, 2, dtype=jnp.float32)
                                    / HEAD_DIM))
    freqs = pos[:, None] * inv_freq[None, :]
    emb = jnp.concatenate([freqs, freqs], axis=-1)            # (S, HEAD_DIM)
    return jnp.cos(emb), jnp.sin(emb)


def rotate_half_matrix():
    # q_rot = q @ R  ==  rotate_half(q) per head ( [-t2, t1] )
    half = HEAD_DIM // 2
    r = np.zeros((HEAD_DIM, HEAD_DIM), np.float32)
    for j in range(half):
        r[j + half, j] = -1.0
    for j in range(half, HEAD_DIM):
        r[j - half, j] = 1.0
    return np.kron(np.eye(N_HEADS, dtype=np.float32), r)      # (H, H)


def init_raw_params(key):
    ks = jax.random.split(key, 9)

    def lin(k, fan_in, fan_out):      # torch nn.Linear weight convention (out, in)
        return jax.random.normal(k, (fan_out, fan_in), jnp.float32) / math.sqrt(fan_in)

    kv_dim = N_KV_HEADS * HEAD_DIM
    return dict(
        wq=lin(ks[0], HIDDEN, HIDDEN), wk=lin(ks[1], HIDDEN, kv_dim),
        wv=lin(ks[2], HIDDEN, kv_dim), wo=lin(ks[3], HIDDEN, HIDDEN),
        wg=lin(ks[4], HIDDEN, FFN), wu=lin(ks[5], HIDDEN, FFN),
        wd=lin(ks[6], FFN, HIDDEN),
        n1=1.0 + 0.1 * jax.random.normal(ks[7], (1, HIDDEN), jnp.float32),
        n2=1.0 + 0.1 * jax.random.normal(ks[8], (1, HIDDEN), jnp.float32),
    )


def build_kernel_params(raw):
    scale = 1.0 / math.sqrt(HEAD_DIM)
    wq_t = raw["wq"].T                                        # (H, H) [in, out]

    def repeat_kv_cols(w):            # GQA: expand kv-head weight cols to NH heads
        wt = w.T                                              # (H, KVH*HD)
        cols = [wt[:, (h // GROUPS) * HEAD_DIM:(h // GROUPS + 1) * HEAD_DIM]
                for h in range(N_HEADS)]
        return jnp.concatenate(cols, axis=1)                  # (H, NH*HD)

    wk_rep = repeat_kv_cols(raw["wk"])
    wv_rep = repeat_kv_cols(raw["wv"])
    R = jnp.asarray(rotate_half_matrix())

    # fused projection, reordered: [q*scale | k | q@R*scale | k@R | v]
    # -> RoPE becomes one 2H-wide FMA; attention-critical cols in first 128 lanes
    wqkv = jnp.concatenate([wq_t * scale, wk_rep,
                            (wq_t @ R) * scale, wk_rep @ R, wv_rep],
                           axis=1)                            # (H, 5H)

    # RoPE tables tiled to full width, packed lane-dense: [cos|cos|sin|sin]
    cos, sin = rope_tables()
    cos_f = jnp.tile(jnp.tile(cos, (1, N_HEADS)), (BATCH, 1))      # (BS, H)
    sin_f = jnp.tile(jnp.tile(sin, (1, N_HEADS)), (BATCH, 1))
    cossin = jnp.concatenate([cos_f, cos_f, sin_f, sin_f], axis=1)  # (BS, 4H)=(16,128)

    # head block-diagonal mask for the stacked-head layout (NH*BS, H)
    q_blockmask = np.kron(np.eye(N_HEADS, dtype=np.float32),
                          np.ones((BS, HEAD_DIM), np.float32))

    # additive attention bias: same-batch + causal + sliding window, tiled per head
    r_idx = np.arange(BS)
    b_i, s_i = r_idx // SEQ, r_idx % SEQ
    allowed = ((b_i[:, None] == b_i[None, :]) &
               (s_i[None, :] <= s_i[:, None]) &
               ((s_i[:, None] - s_i[None, :]) < WINDOW))
    bias = np.where(allowed, 0.0, -1e30).astype(np.float32)        # (BS, BS)
    attn_bias = np.tile(bias, (N_HEADS, 1))                        # (NH*BS, BS)

    # fused slabs (cut input DMA count)
    maskbias = jnp.asarray(np.concatenate([q_blockmask, attn_bias], axis=1))
    norms = jnp.concatenate([raw["n1"], raw["n2"]], axis=0)        # (2, H)
    wogu = jnp.concatenate([raw["wg"].T, raw["wu"].T, raw["wo"].T],
                           axis=1).astype(jnp.bfloat16)            # (H, 2FFN+H)

    return dict(
        norms=norms,
        wqkv=wqkv.astype(jnp.bfloat16),
        wogu=wogu,
        wd=raw["wd"].T.astype(jnp.bfloat16),
        cossin=cossin,
        maskbias=maskbias,
    )


# ------------------------------------------------------------------ f32 reference
def decoder_reference(x, raw):
    cos, sin = rope_tables()
    scale = 1.0 / math.sqrt(HEAD_DIM)

    def rope(t):
        half = HEAD_DIM // 2
        rot = jnp.concatenate([-t[:, half:], t[:, :half]], axis=-1)
        return t * cos + rot * sin

    def one_batch(xb):                                        # (S, H)
        h = _rmsnorm(xb, raw["n1"])
        q = h @ raw["wq"].T
        k = h @ raw["wk"].T
        v = h @ raw["wv"].T
        row = np.arange(SEQ)[:, None]
        col = np.arange(SEQ)[None, :]
        allowed = jnp.asarray((col <= row) & ((row - col) < WINDOW))
        outs = []
        for hi in range(N_HEADS):
            kvi = hi // GROUPS
            qh = rope(q[:, hi * HEAD_DIM:(hi + 1) * HEAD_DIM])
            kh = rope(k[:, kvi * HEAD_DIM:(kvi + 1) * HEAD_DIM])
            vh = v[:, kvi * HEAD_DIM:(kvi + 1) * HEAD_DIM]
            s = (qh @ kh.T) * scale
            s = jnp.where(allowed, s, -1e30)
            outs.append(jax.nn.softmax(s, axis=-1) @ vh)
        attn = jnp.concatenate(outs, axis=-1) @ raw["wo"].T
        xb = xb + attn
        h2 = _rmsnorm(xb, raw["n2"])
        g = h2 @ raw["wg"].T
        u = h2 @ raw["wu"].T
        return xb + (g * jax.nn.sigmoid(g) * u) @ raw["wd"].T

    return jnp.stack([one_batch(x[b]) for b in range(x.shape[0])], axis=0)


# ------------------------------------------------------------------ main
if __name__ == "__main__":
    key = jax.random.PRNGKey(0)
    k_x, k_p = jax.random.split(key)
    x = jax.random.normal(k_x, (BATCH, SEQ, HIDDEN), jnp.float32)

    raw = init_raw_params(k_p)
    kparams = build_kernel_params(raw)

    out = decoder_forward(x, kparams)
    out = jax.block_until_ready(out)

    ref = decoder_reference(x, raw)
    assert out.shape == (BATCH, SEQ, HIDDEN)
    assert bool(jnp.all(jnp.isfinite(out)))
    max_err = float(jnp.max(jnp.abs(out - ref)))
    assert bool(jnp.allclose(out, ref, atol=5e-2, rtol=5e-2)), f"max err {max_err}"
    print("KERNEL_OK")
</pallas_src>

<mosaic_0001>
module attributes {stable_mosaic.version = 11 : i64} {
  func.func @decoder_kernel(%arg0: i32, %arg1: memref<16x32xf32, #tpu.memory_space<vmem>>, %arg2: memref<2x32xf32, #tpu.memory_space<vmem>>, %arg3: memref<32x160xbf16, #tpu.memory_space<vmem>>, %arg4: memref<32x160xbf16, #tpu.memory_space<vmem>>, %arg5: memref<64x32xbf16, #tpu.memory_space<vmem>>, %arg6: memref<16x128xf32, #tpu.memory_space<vmem>>, %arg7: memref<64x48xf32, #tpu.memory_space<vmem>>, %arg8: memref<16x32xf32, #tpu.memory_space<vmem>>) attributes {dimension_semantics = [#tpu.dimension_semantics<arbitrary>], iteration_bounds = array<i64: 1>, scalar_prefetch = 0 : i64, scratch_operands = 0 : i64, tpu.core_type = #tpu.core_type<tc>, window_params = [{pipeline_mode = #tpu.pipeline_mode<synchronous>, transform_indices = @transform_0, window_bounds = array<i64: 16, 32>}, {pipeline_mode = #tpu.pipeline_mode<synchronous>, transform_indices = @transform_1, window_bounds = array<i64: 2, 32>}, {pipeline_mode = #tpu.pipeline_mode<synchronous>, transform_indices = @transform_2, window_bounds = array<i64: 32, 160>}, {pipeline_mode = #tpu.pipeline_mode<synchronous>, transform_indices = @transform_3, window_bounds = array<i64: 32, 160>}, {pipeline_mode = #tpu.pipeline_mode<synchronous>, transform_indices = @transform_4, window_bounds = array<i64: 64, 32>}, {pipeline_mode = #tpu.pipeline_mode<synchronous>, transform_indices = @transform_5, window_bounds = array<i64: 16, 128>}, {pipeline_mode = #tpu.pipeline_mode<synchronous>, transform_indices = @transform_6, window_bounds = array<i64: 64, 48>}, {pipeline_mode = #tpu.pipeline_mode<synchronous>, transform_indices = @transform_7, window_bounds = array<i64: 16, 32>}]} {
    %c0 = arith.constant 0 : index
    %c0_0 = arith.constant 0 : index
    %0 = vector.load %arg1[%c0, %c0_0] : memref<16x32xf32, #tpu.memory_space<vmem>>, vector<16x32xf32>
    %c0_1 = arith.constant 0 : index
    %c0_2 = arith.constant 0 : index
    %1 = vector.load %arg2[%c0_1, %c0_2] : memref<2x32xf32, #tpu.memory_space<vmem>>, vector<1x32xf32>
    %c1 = arith.constant 1 : index
    %c0_3 = arith.constant 0 : index
    %2 = vector.load %arg2[%c1, %c0_3] : memref<2x32xf32, #tpu.memory_space<vmem>>, vector<1x32xf32>
    %3 = arith.mulf %0, %0 : vector<16x32xf32>
    %cst = arith.constant dense<0.000000e+00> : vector<16xf32>
    %4 = vector.multi_reduction <add>, %3, %cst [1] : vector<16x32xf32> to vector<16xf32>
    %5 = vector.shape_cast %4 : vector<16xf32> to vector<16x1xf32>
    %cst_4 = arith.constant 3.200000e+01 : f32
    %6 = vector.broadcast %cst_4 : f32 to vector<16x1xf32>
    %7 = arith.divf %5, %6 : vector<16x1xf32>
    %cst_5 = arith.constant 9.99999997E-7 : f32
    %8 = vector.broadcast %cst_5 : f32 to vector<16x1xf32>
    %9 = arith.addf %7, %8 : vector<16x1xf32>
    %10 = math.rsqrt %9 : vector<16x1xf32>
    %11 = vector.broadcast %10 : vector<16x1xf32> to vector<16x32xf32>
    %12 = arith.mulf %0, %11 : vector<16x32xf32>
    %13 = vector.broadcast %1 : vector<1x32xf32> to vector<16x32xf32>
    %14 = arith.mulf %12, %13 : vector<16x32xf32>
    %15 = arith.truncf %14 : vector<16x32xf32> to vector<16x32xbf16>
    %c0_6 = arith.constant 0 : index
    %c0_7 = arith.constant 0 : index
    %16 = vector.load %arg3[%c0_6, %c0_7] : memref<32x160xbf16, #tpu.memory_space<vmem>>, vector<32x160xbf16>
    %cst_8 = arith.constant dense<0.000000e+00> : vector<16x160xf32>
    %17 = tpu.matmul %15, %16, %cst_8 {dimension_numbers = #tpu.dot_dimension_numbers<[1], [0], [0], [1], [0, 0, 1, 1], [], []>} : vector<16x32xbf16>, vector<32x160xbf16>, vector<16x160xf32> -> vector<16x160xf32>
    %c0_9 = arith.constant 0 : index
    %c0_10 = arith.constant 0 : index
    %18 = vector.load %arg6[%c0_9, %c0_10] : memref<16x128xf32, #tpu.memory_space<vmem>>, vector<16x128xf32>
    %19 = vector.extract_strided_slice %17 {offsets = [0, 0], sizes = [16, 64], strides = [1, 1]} : vector<16x160xf32> to vector<16x64xf32>
    %20 = vector.extract_strided_slice %18 {offsets = [0, 0], sizes = [16, 64], strides = [1, 1]} : vector<16x128xf32> to vector<16x64xf32>
    %21 = arith.mulf %19, %20 : vector<16x64xf32>
    %22 = vector.extract_strided_slice %17 {offsets = [0, 64], sizes = [16, 64], strides = [1, 1]} : vector<16x160xf32> to vector<16x64xf32>
    %23 = vector.extract_strided_slice %18 {offsets = [0, 64], sizes = [16, 64], strides = [1, 1]} : vector<16x128xf32> to vector<16x64xf32>
    %24 = arith.mulf %22, %23 : vector<16x64xf32>
    %25 = arith.addf %21, %24 : vector<16x64xf32>
    %26 = vector.extract_strided_slice %25 {offsets = [0, 0], sizes = [16, 32], strides = [1, 1]} : vector<16x64xf32> to vector<16x32xf32>
    %27 = vector.extract_strided_slice %25 {offsets = [0, 32], sizes = [16, 32], strides = [1, 1]} : vector<16x64xf32> to vector<16x32xf32>
    %28 = vector.extract_strided_slice %17 {offsets = [0, 128], sizes = [16, 32], strides = [1, 1]} : vector<16x160xf32> to vector<16x32xf32>
    %c0_11 = arith.constant 0 : index
    %c0_12 = arith.constant 0 : index
    %29 = vector.load %arg7[%c0_11, %c0_12] : memref<64x48xf32, #tpu.memory_space<vmem>>, vector<64x48xf32>
    %30 = vector.extract_strided_slice %29 {offsets = [0, 0], sizes = [64, 32], strides = [1, 1]} : vector<64x48xf32> to vector<64x32xf32>
    %31 = vector.extract_strided_slice %29 {offsets = [0, 32], sizes = [64, 16], strides = [1, 1]} : vector<64x48xf32> to vector<64x16xf32>
    %32 = tpu.concatenate %26, %26, %26, %26 in 0 : vector<16x32xf32>, vector<16x32xf32>, vector<16x32xf32>, vector<16x32xf32> -> vector<64x32xf32>
    %33 = arith.mulf %32, %30 : vector<64x32xf32>
    %34 = arith.truncf %33 : vector<64x32xf32> to vector<64x32xbf16>
    %35 = arith.truncf %27 : vector<16x32xf32> to vector<16x32xbf16>
    %cst_13 = arith.constant dense<0.000000e+00> : vector<64x16xf32>
    %36 = tpu.matmul %34, %35, %cst_13 {dimension_numbers = #tpu.dot_dimension_numbers<[1], [1], [0], [0], [0, 0, 1, 0], [], []>} : vector<64x32xbf16>, vector<16x32xbf16>, vector<64x16xf32> -> vector<64x16xf32>
    %37 = arith.addf %36, %31 : vector<64x16xf32>
    %cst_14 = arith.constant dense<0xFF800000> : vector<64xf32>
    %38 = vector.multi_reduction <maximumf>, %37, %cst_14 [1] : vector<64x16xf32> to vector<64xf32>
    %39 = vector.shape_cast %38 : vector<64xf32> to vector<64x1xf32>
    %40 = vector.broadcast %39 : vector<64x1xf32> to vector<64x16xf32>
    %41 = arith.subf %37, %40 : vector<64x16xf32>
    %42 = math.exp %41 : vector<64x16xf32>
    %cst_15 = arith.constant dense<0.000000e+00> : vector<64xf32>
    %43 = vector.multi_reduction <add>, %42, %cst_15 [1] : vector<64x16xf32> to vector<64xf32>
    %44 = vector.shape_cast %43 : vector<64xf32> to vector<64x1xf32>
    %45 = tpu.reciprocal %44 {approx = true} : vector<64x1xf32> -> vector<64x1xf32>
    %46 = vector.broadcast %45 : vector<64x1xf32> to vector<64x16xf32>
    %47 = arith.mulf %42, %46 : vector<64x16xf32>
    %48 = arith.truncf %47 : vector<64x16xf32> to vector<64x16xbf16>
    %49 = arith.truncf %28 : vector<16x32xf32> to vector<16x32xbf16>
    %cst_16 = arith.constant dense<0.000000e+00> : vector<64x32xf32>
    %50 = tpu.matmul %48, %49, %cst_16 {dimension_numbers = #tpu.dot_dimension_numbers<[1], [0], [0], [1], [0, 0, 1, 1], [], []>} : vector<64x16xbf16>, vector<16x32xbf16>, vector<64x32xf32> -> vector<64x32xf32>
    %51 = arith.mulf %50, %30 : vector<64x32xf32>
    %52 = vector.extract_strided_slice %51 {offsets = [0, 0], sizes = [16, 32], strides = [1, 1]} : vector<64x32xf32> to vector<16x32xf32>
    %53 = vector.extract_strided_slice %51 {offsets = [16, 0], sizes = [16, 32], strides = [1, 1]} : vector<64x32xf32> to vector<16x32xf32>
    %54 = arith.addf %52, %53 : vector<16x32xf32>
    %55 = vector.extract_strided_slice %51 {offsets = [32, 0], sizes = [16, 32], strides = [1, 1]} : vector<64x32xf32> to vector<16x32xf32>
    %56 = arith.addf %54, %55 : vector<16x32xf32>
    %57 = vector.extract_strided_slice %51 {offsets = [48, 0], sizes = [16, 32], strides = [1, 1]} : vector<64x32xf32> to vector<16x32xf32>
    %58 = arith.addf %56, %57 : vector<16x32xf32>
    %c0_17 = arith.constant 0 : index
    %c0_18 = arith.constant 0 : index
    %59 = vector.load %arg4[%c0_17, %c0_18] : memref<32x160xbf16, #tpu.memory_space<vmem>>, vector<32x160xbf16>
    %60 = vector.extract_strided_slice %59 {offsets = [0, 0], sizes = [32, 128], strides = [1, 1]} : vector<32x160xbf16> to vector<32x128xbf16>
    %61 = vector.extract_strided_slice %59 {offsets = [0, 128], sizes = [32, 32], strides = [1, 1]} : vector<32x160xbf16> to vector<32x32xbf16>
    %62 = arith.truncf %58 : vector<16x32xf32> to vector<16x32xbf16>
    %cst_19 = arith.constant dense<0.000000e+00> : vector<16x32xf32>
    %63 = tpu.matmul %62, %61, %cst_19 {dimension_numbers = #tpu.dot_dimension_numbers<[1], [0], [0], [1], [0, 0, 1, 1], [], []>} : vector<16x32xbf16>, vector<32x32xbf16>, vector<16x32xf32> -> vector<16x32xf32>
    %64 = arith.addf %0, %63 : vector<16x32xf32>
    %65 = arith.mulf %64, %64 : vector<16x32xf32>
    %cst_20 = arith.constant dense<0.000000e+00> : vector<16xf32>
    %66 = vector.multi_reduction <add>, %65, %cst_20 [1] : vector<16x32xf32> to vector<16xf32>
    %67 = vector.shape_cast %66 : vector<16xf32> to vector<16x1xf32>
    %cst_21 = arith.constant 3.200000e+01 : f32
    %68 = vector.broadcast %cst_21 : f32 to vector<16x1xf32>
    %69 = arith.divf %67, %68 : vector<16x1xf32>
    %cst_22 = arith.constant 9.99999997E-7 : f32
    %70 = vector.broadcast %cst_22 : f32 to vector<16x1xf32>
    %71 = arith.addf %69, %70 : vector<16x1xf32>
    %72 = math.rsqrt %71 : vector<16x1xf32>
    %73 = vector.broadcast %72 : vector<16x1xf32> to vector<16x32xf32>
    %74 = arith.mulf %64, %73 : vector<16x32xf32>
    %75 = vector.broadcast %2 : vector<1x32xf32> to vector<16x32xf32>
    %76 = arith.mulf %74, %75 : vector<16x32xf32>
    %77 = arith.truncf %76 : vector<16x32xf32> to vector<16x32xbf16>
    %cst_23 = arith.constant dense<0.000000e+00> : vector<16x128xf32>
    %78 = tpu.matmul %77, %60, %cst_23 {dimension_numbers = #tpu.dot_dimension_numbers<[1], [0], [0], [1], [0, 0, 1, 1], [], []>} : vector<16x32xbf16>, vector<32x128xbf16>, vector<16x128xf32> -> vector<16x128xf32>
    %79 = vector.extract_strided_slice %78 {offsets = [0, 0], sizes = [16, 64], strides = [1, 1]} : vector<16x128xf32> to vector<16x64xf32>
    %80 = vector.extract_strided_slice %78 {offsets = [0, 64], sizes = [16, 64], strides = [1, 1]} : vector<16x128xf32> to vector<16x64xf32>
    %81 = arith.negf %79 : vector<16x64xf32>
    %82 = math.exp %81 : vector<16x64xf32>
    %cst_24 = arith.constant 1.000000e+00 : f32
    %83 = vector.broadcast %cst_24 : f32 to vector<16x64xf32>
    %84 = arith.addf %83, %82 : vector<16x64xf32>
    %85 = arith.divf %83, %84 : vector<16x64xf32>
    %86 = arith.mulf %79, %85 : vector<16x64xf32>
    %87 = arith.mulf %86, %80 : vector<16x64xf32>
    %88 = arith.truncf %87 : vector<16x64xf32> to vector<16x64xbf16>
    %c0_25 = arith.constant 0 : index
    %c0_26 = arith.constant 0 : index
    %89 = vector.load %arg5[%c0_25, %c0_26] : memref<64x32xbf16, #tpu.memory_space<vmem>>, vector<64x32xbf16>
    %cst_27 = arith.constant dense<0.000000e+00> : vector<16x32xf32>
    %90 = tpu.matmul %88, %89, %cst_27 {dimension_numbers = #tpu.dot_dimension_numbers<[1], [0], [0], [1], [0, 0, 1, 1], [], []>} : vector<16x64xbf16>, vector<64x32xbf16>, vector<16x32xf32> -> vector<16x32xf32>
    %91 = arith.addf %64, %90 : vector<16x32xf32>
    %c0_28 = arith.constant 0 : index
    %c0_29 = arith.constant 0 : index
    %92 = vector.load %arg8[%c0_28, %c0_29] : memref<16x32xf32, #tpu.memory_space<vmem>>, vector<16x32xf32>
    tpu.vector_store %arg8[%c0_28, %c0_29], %91 {strides = array<i32>} : memref<16x32xf32, #tpu.memory_space<vmem>>, vector<16x32xf32>,
    return
  }
  func.func @transform_0(%arg0: i32) -> (i32, i32) {
    %c0_i32 = arith.constant 0 : i32
    %c0_i32_0 = arith.constant 0 : i32
    %c0_i32_1 = arith.constant 0 : i32
    return %c0_i32, %c0_i32_0 : i32, i32
  }
  func.func @transform_1(%arg0: i32) -> (i32, i32) {
    %c0_i32 = arith.constant 0 : i32
    %c0_i32_0 = arith.constant 0 : i32
    %c0_i32_1 = arith.constant 0 : i32
    return %c0_i32, %c0_i32_0 : i32, i32
  }
  func.func @transform_2(%arg0: i32) -> (i32, i32) {
    %c0_i32 = arith.constant 0 : i32
    %c0_i32_0 = arith.constant 0 : i32
    %c0_i32_1 = arith.constant 0 : i32
    return %c0_i32, %c0_i32_0 : i32, i32
  }
  func.func @transform_3(%arg0: i32) -> (i32, i32) {
    %c0_i32 = arith.constant 0 : i32
    %c0_i32_0 = arith.constant 0 : i32
    %c0_i32_1 = arith.constant 0 : i32
    return %c0_i32, %c0_i32_0 : i32, i32
  }
  func.func @transform_4(%arg0: i32) -> (i32, i32) {
    %c0_i32 = arith.constant 0 : i32
    %c0_i32_0 = arith.constant 0 : i32
    %c0_i32_1 = arith.constant 0 : i32
    return %c0_i32, %c0_i32_0 : i32, i32
  }
  func.func @transform_5(%arg0: i32) -> (i32, i32) {
    %c0_i32 = arith.constant 0 : i32
    %c0_i32_0 = arith.constant 0 : i32
    %c0_i32_1 = arith.constant 0 : i32
    return %c0_i32, %c0_i32_0 : i32, i32
  }
  func.func @transform_6(%arg0: i32) -> (i32, i32) {
    %c0_i32 = arith.constant 0 : i32
    %c0_i32_0 = arith.constant 0 : i32
    %c0_i32_1 = arith.constant 0 : i32
    return %c0_i32, %c0_i32_0 : i32, i32
  }
  func.func @transform_7(%arg0: i32) -> (i32, i32) {
    %c0_i32 = arith.constant 0 : i32
    %c0_i32_0 = arith.constant 0 : i32
    %c0_i32_1 = arith.constant 0 : i32
    return %c0_i32, %c0_i32_0 : i32, i32
  }
}

</mosaic_0001>

<bundles_post_ra>
// kernel: tpu_custom_call.1
= control target key start
LH: loop header
LB: loop body
LE: loop exit
PB: predicated region body
PF: predicated region fallthrough
CT: control target
= control target key end

     0   :  { %vm34_vm0 = vcmask 261120   ;;  %s1046_s0 = inlined_call_operand.vmem [shape: f32[16,32], index: 0, kind: input, shape index: {}]   ;;  %s1047_s1 = inlined_call_operand.vmem [shape: f32[2,32], index: 1, kind: input, shape index: {}]   ;;  %s1048_s2 = inlined_call_operand.vmem [shape: bf16[32,160], index: 2, kind: input, shape index: {}]   ;;  %s1049_s3 = inlined_call_operand.vmem [shape: bf16[32,160], index: 3, kind: input, shape index: {}]   ;;  %s1050_s4 = inlined_call_operand.vmem [shape: bf16[64,32], index: 4, kind: input, shape index: {}]   ;;  %s1051_s5 = inlined_call_operand.vmem [shape: f32[16,128], index: 5, kind: input, shape index: {}]   ;;  %s1052_s6 = inlined_call_operand.vmem [shape: f32[64,48], index: 6, kind: input, shape index: {}]   ;;  %s1053_s7 = inlined_call_operand.hbm [shape: f32[16,32], index: 7, kind: output, shape index: {}]  }
   0x1   :  { %v826_v0 = vld [vmem:[%s1046_s0] sm:$0xff] }
   0x2   :  { %v32_v1 = vmul.f32 %v826_v0, %v826_v0 }
   0x3   :  { %12 = vsyncpa [#allocation3], 0  ;;  %v833_v2 = vld [vmem:[%s1046_s0 + $0x8] sm:$0xff]  ;;  %v777_v6 = vmov 32.0   ;;  %v628_v12 = vld [vmem:[%s1048_s2 + $0x10] sm:$0xf] }
   0x4   :  { %v35_v3 = vsel %vm34_vm0, %v32_v1, 0.0  ;;  %v33_v4 = vmul.f32 %v833_v2, %v833_v2  ;;  %701 = vrcp.f32 %v777_v6  ;;  %v684_v13 = vld [vmem:[%s1048_s2 + $0x14] sm:$0xf0]  ;;  %v683_v14 = vld [vmem:[%s1048_s2 + $0x14] sm:$0xf]  ;;  %v133_v51 = vld [vmem:[%s1051_s5] sm:$0xff] }
   0x5   :  { %36 = vadd.xlane.f32.xlu0 %v35_v3  ;;  %v629_v15 = vor.u32 %v684_v13, %v628_v12  ;;  %v630_v16 = vld [vmem:[%s1048_s2 + $0x18] sm:$0xf0]  ;;  %v620_v19 = vld [vmem:[%s1048_s2] sm:$0xf]  ;;  %v682_v20 = vld [vmem:[%s1048_s2 + $0x4] sm:$0xf0] }
   0x6   :  { %v38_v5 = vsel %vm34_vm0, %v33_v4, 0.0  ;;  %v633_v17 = vor.u32 %v683_v14, %v630_v16  ;;  %v681_v21 = vld [vmem:[%s1048_s2 + $0x4] sm:$0xf]  ;;  %v621_v22 = vor.u32 %v682_v20, %v620_v19  ;;  %v622_v23 = vld [vmem:[%s1048_s2 + $0x8] sm:$0xf0]  ;;  %s778_s23 = smov 64  }
   0x7   :  { %111 = vmatpush.bf16.msra.mxu0 %v629_v15  ;;  %v625_v25 = vor.u32 %v681_v21, %v622_v23  ;;  %v699_v45 = vld [vmem:[%s1047_s1] ss:$0 sm:$0xff]  ;;  %v134_v55 = vld [vmem:[%s1051_s5 + $0x8] sm:$0xff]  ;;  %v885_v60 = vld [vmem:[%s1052_s6 + $0x10] sm:$0xff]  ;;  %s779_s28 = smov 96   ;;  %vm247_vm8 = vcmask 130048  }
   0x8   :  { %125 = vmatpush.bf16.msra.mxu1 %v633_v17  ;;  %v892_v61 = vld [vmem:[%s1052_s6 + $0x8] sm:$0xff]  ;;  %v897_v62 = vld [vmem:[%s1052_s6 + $0x20] sm:$0xff]  ;;  %v906_v63 = vld [vmem:[%s1052_s6 + $0x30] sm:$0xff]  ;;  %s781_s18 = smov 128   ;;  %s782_s19 = smov 8  }
   0x9   :  { %v913_v1 = vld [vmem:[%s1052_s6 + $0x38] sm:$0xff] }
   0xa   :  { %v702_v7 = vpop.eup %701 }
   0xb   :  { %v42_v8 = vmul.f32 32.0, %v702_v7  ;;  %vm46_vm1 = vweird.f32 %v702_v7  ;;  %112 = vmatpush.bf16.msra.mxu0 %v621_v22 }
   0xc   :  { %126 = vmatpush.bf16.msra.mxu1 %v625_v25 }
   0xd   :  { %39 = vadd.xlane.f32.xlu0 %v38_v5  ;;  %v43_v9 = vsub.f32 1.0, %v42_v8  ;;  %v920_v5 = vld [vmem:[%s1052_s6] sm:$0xff]  ;;  %v930_v8 = vld [vmem:[%s1052_s6 + $0x28] sm:$0xff] }
   0xf   :  { %v44_v10 = vmul.f32 %v702_v7, %v43_v9 }
  0x11   :  { %v45_v11 = vadd.f32 %v702_v7, %v44_v10 }
  0x13   :  { %v851_v18 = vsel %vm46_vm1, %v702_v7, %v45_v11  ;;  %v925_v7 = vld [vmem:[%s1052_s6 + $0x18] sm:$0xff]  ;;  %s606_s6 = sshll.u32 %s1053_s7, 4  ;;  %s607_s6 = int_to_ptr.hbm [resolvable:$true] %s606_s6 }
  0x21   :  { %181 = vrot.lane.b32.xlu0 %v892_v61, %s779_s28 }
  0x29   :  { %191 = vrot.lane.b32.xlu0 %v906_v63, %s779_s28 }
  0x31   :  { %193 = vrot.lane.b32.xlu0 %v913_v1, %s779_s28 }
  0x78   :  { %v37_v24 = vpop.xlane.xlu0 %36 }
  0x79   :  { %v48_v26 = vmul.f32 %v851_v18, %v37_v24 }
  0x7b   :  { %v50_v27 = vadd.f32 1e-06, %v48_v26 }
  0x7d   :  { %703 = vrsqrt.f32 %v50_v27  ;;  %vm58_vm3 = vweird.f32 %v50_v27 }
  0x80   :  { %v40_v28 = vpop.xlane.xlu0 %39 }
  0x81   :  { %v49_v29 = vmul.f32 %v851_v18, %v40_v28 }
  0x83   :  { %v704_v30 = vpop.eup %703  ;;  %v51_v31 = vadd.f32 1e-06, %v49_v29 }
  0x84   :  { %v53_v32 = vmul.f32 %v704_v30, %v50_v27  ;;  %vm59_vm2 = vweird.f32 %v704_v30 }
  0x85   :  { %705 = vrsqrt.f32 %v51_v31  ;;  %vm60_vm4 = vmor %vm58_vm3, %vm59_vm2  ;;  %vm68_vm6 = vweird.f32 %v51_v31 }
  0x86   :  { %v54_v33 = vmul.f32 %v704_v30, %v53_v32 }
  0x88   :  { %v55_v34 = vmul.f32 0.5, %v54_v33 }
  0x8a   :  { %v56_v35 = vsub.f32 1.5, %v55_v34 }
  0x8b   :  { %v706_v36 = vpop.eup %705 }
  0x8c   :  { %v63_v37 = vmul.f32 %v706_v36, %v51_v31  ;;  %v57_v38 = vmul.f32 %v704_v30, %v56_v35  ;;  %vm69_vm5 = vweird.f32 %v706_v36 }
  0x8d   :  { %vm70_vm7 = vmor %vm68_vm6, %vm69_vm5 }
  0x8e   :  { %v64_v39 = vmul.f32 %v706_v36, %v63_v37  ;;  %v61_v41 = vsel %vm60_vm4, %v704_v30, %v57_v38 }
  0x8f   :  { %v72_v44 = vmul.f32 %v61_v41, %v826_v0 }
  0x90   :  { %v65_v40 = vmul.f32 0.5, %v64_v39 }
  0x91   :  { %v75_v48 = vmul.f32 %v699_v45, %v72_v44 }
  0x92   :  { %v66_v42 = vsub.f32 1.5, %v65_v40 }
  0x93   :  { %v182_v30 = vpop.permute.xlu0 %181 }
  0x94   :  { %v67_v43 = vmul.f32 %v706_v36, %v66_v42 }
  0x96   :  { %v71_v46 = vsel %vm70_vm7, %v706_v36, %v67_v43 }
  0x97   :  { %v73_v47 = vmul.f32 %v71_v46, %v833_v2 }
  0x99   :  { %v76_v49 = vmul.f32 %v699_v45, %v73_v47 }
  0x9b   :  { %v77_v50 = vpack.c.bf16 %v76_v49, %v75_v48 }
  0x9d   :  { %634 = vmatmul.msk.bf16.vlgmr.msra.gmra.mxu0 %vm34_vm0, %v77_v50  ;;  %635 = vmatmul.msk.bf16.vlgmr.msra.gmra.mxu1 %vm34_vm0, %v77_v50  ;;  %v192_v50 = vpop.permute.xlu0 %191 }
 0x11a   :  { %v114_v52 = vpop.f32.mrf.mxu0  ;;  %v128_v53 = vpop.f32.mrf.mxu1 }
 0x11b   :  { %v135_v54 = vmul.f32 %v133_v51, %v114_v52 }
 0x11d   :  { %139 = vrot.lane.b32.xlu1 %v135_v54, %s778_s23 }
 0x122   :  { %v116_v56 = vpop.f32.mrf.mxu0  ;;  %v130_v57 = vpop.f32.mrf.mxu1 }
 0x123   :  { %v136_v58 = vmul.f32 %v134_v55, %v116_v56  ;;  %v340_v59 = vpack.c.bf16 %v130_v57, %v128_v53 }
 0x125   :  { %360 = vmatpush.bf16.msra.mxu3 %v340_v59  ;;  %141 = vrot.lane.b32.xlu1 %v136_v58, %s778_s23 }
 0x12d   :  { %183 = vrot.lane.b32.xlu1 %v885_v60, %s779_s28 }
 0x135   :  { %187 = vrot.lane.b32.xlu1 %v897_v62, %s779_s28 }
 0x18f   :  { %v140_v3 = vpop.permute.xlu1 %139 }
 0x190   :  { %v145_v4 = vadd.f32 %v140_v3, %v135_v54  ;;  %v194_v54 = vpop.permute.xlu0 %193 }
 0x192   :  { %v155_v10 = vmul.f32 %v920_v5, %v145_v4  ;;  %v157_v11 = vmul.f32 %v885_v60, %v145_v4  ;;  %v159_v12 = vmul.f32 %v897_v62, %v145_v4  ;;  %v161_v17 = vmul.f32 %v906_v63, %v145_v4 }
 0x197   :  { %v142_v6 = vpop.permute.xlu1 %141 }
 0x198   :  { %v146_v9 = vadd.f32 %v142_v6, %v136_v58 }
 0x19a   :  { %v167_v13 = vpack.c.bf16 %v146_v9, %v145_v4  ;;  %v156_v14 = vmul.f32 %v892_v61, %v146_v9  ;;  %v158_v15 = vmul.f32 %v925_v7, %v146_v9  ;;  %v160_v16 = vmul.f32 %v930_v8, %v146_v9 }
 0x19b   :  { %v162_v19 = vmul.f32 %v913_v1, %v146_v9 }
 0x19c   :  { %169 = vrot.lane.b32.xlu2 %v167_v13, %s779_s28  ;;  %v163_v20 = vpack.c.bf16 %v156_v14, %v155_v10  ;;  %v164_v21 = vpack.c.bf16 %v158_v15, %v157_v11  ;;  %v165_v22 = vpack.c.bf16 %v160_v16, %v159_v12 }
 0x19d   :  { %v166_v23 = vpack.c.bf16 %v162_v19, %v161_v17 }
 0x19f   :  { %v184_v34 = vpop.permute.xlu1 %183 }
 0x1a4   :  { %179 = vrot.lane.b32.xlu2 %v920_v5, %s779_s28 }
 0x1a7   :  { %v188_v42 = vpop.permute.xlu1 %187 }
 0x1ac   :  { %185 = vrot.lane.b32.xlu2 %v925_v7, %s779_s28 }
 0x1b4   :  { %189 = vrot.lane.b32.xlu2 %v930_v8, %s779_s28 }
 0x1f6   :  { %v170_v24 = vpop.permute.xlu2 %169 }
 0x1f7   :  { %v216_v25 = vsel %vm34_vm0, %v170_v24, 0 }
 0x1f8   :  { %225 = vmatpush.bf16.xpose.msra.mxu2 %v216_v25 }
 0x1fe   :  { %v180_v26 = vpop.permute.xlu2 %179 }
 0x1ff   :  { %636 = vmatmul.msk.bf16.vlgmr.msra.gmra.mxu2 %vm34_vm0, %v163_v20 }
 0x206   :  { %v186_v38 = vpop.permute.xlu2 %185 }
 0x20e   :  { %v190_v46 = vpop.permute.xlu2 %189 }
 0x20f   :  { %637 = vmatmul.msk.bf16.gmra.mxu2 %vm34_vm0, %v164_v21 }
 0x21f   :  { %638 = vmatmul.msk.bf16.gmra.mxu2 %vm34_vm0, %v165_v22 }
 0x22f   :  { %639 = vmatmul.msk.bf16.gmra.mxu2 %vm34_vm0, %v166_v23 }
 0x282   :  { %v227_v27 = vpop.f32.mrf.mxu2 }
 0x283   :  { %v228_v28 = vadd.f32 %v227_v27, %v180_v26 }
 0x285   :  { %v248_v29 = vsel %vm247_vm8, %v228_v28, -inf }
 0x286   :  { %249 = vmax.xlane.f32.xlu1 %v248_v29 }
 0x28a   :  { %v229_v31 = vpop.f32.mrf.mxu2 }
 0x28b   :  { %v230_v32 = vadd.f32 %v229_v31, %v182_v30 }
 0x28d   :  { %v251_v33 = vsel %vm247_vm8, %v230_v32, -inf }
 0x28e   :  { %252 = vmax.xlane.f32.xlu2 %v251_v33 }
 0x292   :  { %v232_v35 = vpop.f32.mrf.mxu2 }
 0x293   :  { %v233_v36 = vadd.f32 %v232_v35, %v184_v34 }
 0x295   :  { %v254_v37 = vsel %vm247_vm8, %v233_v36, -inf }
 0x296   :  { %255 = vmax.xlane.f32.xlu0 %v254_v37 }
 0x29a   :  { %v234_v39 = vpop.f32.mrf.mxu2 }
 0x29b   :  { %v235_v40 = vadd.f32 %v234_v39, %v186_v38 }
 0x29d   :  { %v257_v41 = vsel %vm247_vm8, %v235_v40, -inf }
 0x29e   :  { %258 = vmax.xlane.f32.xlu2 %v257_v41 }
 0x2a2   :  { %v237_v43 = vpop.f32.mrf.mxu2 }
 0x2a3   :  { %v238_v44 = vadd.f32 %v237_v43, %v188_v42 }
 0x2a5   :  { %v260_v45 = vsel %vm247_vm8, %v238_v44, -inf }
 0x2a6   :  { %261 = vmax.xlane.f32.xlu1 %v260_v45 }
 0x2aa   :  { %v239_v47 = vpop.f32.mrf.mxu2 }
 0x2ab   :  { %v240_v48 = vadd.f32 %v239_v47, %v190_v46 }
 0x2ad   :  { %v263_v49 = vsel %vm247_vm8, %v240_v48, -inf }
 0x2ae   :  { %264 = vmax.xlane.f32.xlu2 %v263_v49 }
 0x2b2   :  { %v242_v51 = vpop.f32.mrf.mxu2 }
 0x2b3   :  { %v243_v52 = vadd.f32 %v242_v51, %v192_v50 }
 0x2b5   :  { %v266_v53 = vsel %vm247_vm8, %v243_v52, -inf }
 0x2b6   :  { %267 = vmax.xlane.f32.xlu1 %v266_v53 }
 0x2ba   :  { %v244_v55 = vpop.f32.mrf.mxu2 }
 0x2bb   :  { %v245_v56 = vadd.f32 %v244_v55, %v194_v54 }
 0x2bd   :  { %v269_v57 = vsel %vm247_vm8, %v245_v56, -inf }
 0x2be   :  { %270 = vmax.xlane.f32.xlu2 %v269_v57 }
 0x2f9   :  { %v250_v58 = vpop.xlane.xlu1 %249 }
 0x2fa   :  { %v272_v59 = vsub.f32 %v228_v28, %v250_v58 }
 0x2fc   :  { %v280_v3 = vmul.f32 1.442695, %v272_v59 }
 0x2fe   :  { %707 = vpow2.f32 %v280_v3 }
 0x301   :  { %v253_v4 = vpop.xlane.xlu2 %252 }
 0x302   :  { %v273_v6 = vsub.f32 %v230_v32, %v253_v4 }
 0x304   :  { %v708_v9 = vpop.eup %707  ;;  %v282_v10 = vmul.f32 1.442695, %v273_v6 }
 0x305   :  { %v296_v11 = vsel %vm247_vm8, %v708_v9, 0.0 }
 0x306   :  { %709 = vpow2.f32 %v282_v10  ;;  %297 = vadd.xlane.f32.xlu1 %v296_v11 }
 0x309   :  { %v256_v12 = vpop.xlane.xlu0 %255 }
 0x30a   :  { %v274_v13 = vsub.f32 %v233_v36, %v256_v12 }
 0x30c   :  { %v710_v14 = vpop.eup %709  ;;  %v284_v15 = vmul.f32 1.442695, %v274_v13 }
 0x30d   :  { %v299_v16 = vsel %vm247_vm8, %v710_v14, 0.0 }
 0x30e   :  { %711 = vpow2.f32 %v284_v15  ;;  %300 = vadd.xlane.f32.xlu0 %v299_v16 }
 0x311   :  { %v259_v17 = vpop.xlane.xlu2 %258 }
 0x312   :  { %v275_v19 = vsub.f32 %v235_v40, %v259_v17 }
 0x314   :  { %v712_v20 = vpop.eup %711  ;;  %v286_v21 = vmul.f32 1.442695, %v275_v19 }
 0x315   :  { %v302_v22 = vsel %vm247_vm8, %v712_v20, 0.0 }
 0x316   :  { %713 = vpow2.f32 %v286_v21  ;;  %303 = vadd.xlane.f32.xlu2 %v302_v22  ;;  %v687_v22 = vld [vmem:[%s1049_s3 + $0x14] sm:$0xf] }
 0x319   :  { %v262_v23 = vpop.xlane.xlu1 %261 }
 0x31a   :  { %v276_v24 = vsub.f32 %v238_v44, %v262_v23  ;;  %v648_v23 = vld [vmem:[%s1049_s3 + $0x18] sm:$0xf0] }
 0x31c   :  { %v714_v25 = vpop.eup %713  ;;  %v288_v26 = vmul.f32 1.442695, %v276_v24  ;;  %v651_v24 = vor.u32 %v687_v22, %v648_v23 }
 0x31d   :  { %v305_v27 = vsel %vm247_vm8, %v714_v25, 0.0 }
 0x31e   :  { %715 = vpow2.f32 %v288_v26  ;;  %306 = vadd.xlane.f32.xlu1 %v305_v27  ;;  %422 = vmatpush.bf16.msrb.mxu0 %v651_v24  ;;  %v685_v26 = vld [vmem:[%s1049_s3 + $0x4] sm:$0xf]  ;;  %v644_v27 = vld [vmem:[%s1049_s3 + $0x8] sm:$0xf0] }
 0x321   :  { %v265_v28 = vpop.xlane.xlu2 %264 }
 0x322   :  { %v277_v29 = vsub.f32 %v240_v48, %v265_v28  ;;  %v647_v28 = vor.u32 %v685_v26, %v644_v27 }
 0x324   :  { %v716_v30 = vpop.eup %715  ;;  %v290_v31 = vmul.f32 1.442695, %v277_v29  ;;  %423 = vmatpush.bf16.msrb.mxu0 %v647_v28 }
 0x325   :  { %v308_v32 = vsel %vm247_vm8, %v716_v30, 0.0 }
 0x326   :  { %717 = vpow2.f32 %v290_v31  ;;  %309 = vadd.xlane.f32.xlu0 %v308_v32 }
 0x329   :  { %v268_v33 = vpop.xlane.xlu1 %267 }
 0x32a   :  { %v278_v34 = vsub.f32 %v243_v52, %v268_v33 }
 0x32c   :  { %v718_v35 = vpop.eup %717  ;;  %v292_v36 = vmul.f32 1.442695, %v278_v34 }
 0x32d   :  { %v311_v37 = vsel %vm247_vm8, %v718_v35, 0.0 }
 0x32e   :  { %719 = vpow2.f32 %v292_v36  ;;  %312 = vadd.xlane.f32.xlu2 %v311_v37 }
 0x331   :  { %v271_v38 = vpop.xlane.xlu2 %270 }
 0x332   :  { %v279_v39 = vsub.f32 %v245_v56, %v271_v38 }
 0x334   :  { %v720_v40 = vpop.eup %719  ;;  %v294_v41 = vmul.f32 1.442695, %v279_v39 }
 0x335   :  { %v314_v42 = vsel %vm247_vm8, %v720_v40, 0.0 }
 0x336   :  { %721 = vpow2.f32 %v294_v41  ;;  %315 = vadd.xlane.f32.xlu1 %v314_v42 }
 0x33c   :  { %v722_v43 = vpop.eup %721 }
 0x33d   :  { %v317_v44 = vsel %vm247_vm8, %v722_v43, 0.0 }
 0x33e   :  { %318 = vadd.xlane.f32.xlu0 %v317_v44 }
 0x379   :  { %v298_v45 = vpop.xlane.xlu1 %297 }
 0x37a   :  { %723 = vrcp.f32 %v298_v45 }
 0x380   :  { %v724_v47 = vpop.eup %723 }
 0x381   :  { %v301_v46 = vpop.xlane.xlu0 %300  ;;  %v328_v49 = vmul.f32 %v724_v47, %v708_v9 }
 0x382   :  { %725 = vrcp.f32 %v301_v46 }
 0x388   :  { %v726_v48 = vpop.eup %725 }
 0x389   :  { %v329_v50 = vmul.f32 %v726_v48, %v710_v14  ;;  %v304_v52 = vpop.xlane.xlu2 %303 }
 0x38a   :  { %727 = vrcp.f32 %v304_v52 }
 0x38b   :  { %v336_v51 = vpack.c.bf16 %v329_v50, %v328_v49  ;;  %v688_v49 = vld [vmem:[%s1049_s3 + $0x14] sm:$0xf0] }
 0x38d   :  { %640 = vmatmul.msk.bf16.vlgmr.msra.gmra.mxu3 %vm247_vm8, %v336_v51  ;;  %v686_v51 = vld [vmem:[%s1049_s3 + $0x4] sm:$0xf0] }
 0x390   :  { %v728_v54 = vpop.eup %727 }
 0x391   :  { %v307_v53 = vpop.xlane.xlu1 %306  ;;  %v330_v56 = vmul.f32 %v728_v54, %v712_v20 }
 0x392   :  { %729 = vrcp.f32 %v307_v53 }
 0x398   :  { %v730_v55 = vpop.eup %729 }
 0x399   :  { %v331_v57 = vmul.f32 %v730_v55, %v714_v25  ;;  %v310_v59 = vpop.xlane.xlu0 %309 }
 0x39a   :  { %731 = vrcp.f32 %v310_v59 }
 0x39b   :  { %v337_v58 = vpack.c.bf16 %v331_v57, %v330_v56 }
 0x39d   :  { %641 = vmatmul.msk.bf16.gmra.mxu3 %vm247_vm8, %v337_v58 }
 0x3a0   :  { %v732_v4 = vpop.eup %731 }
 0x3a1   :  { %v313_v3 = vpop.xlane.xlu2 %312  ;;  %v332_v9 = vmul.f32 %v732_v4, %v716_v30 }
 0x3a2   :  { %733 = vrcp.f32 %v313_v3 }
 0x3a8   :  { %v734_v6 = vpop.eup %733 }
 0x3a9   :  { %v333_v10 = vmul.f32 %v734_v6, %v718_v35  ;;  %v316_v12 = vpop.xlane.xlu1 %315 }
 0x3aa   :  { %735 = vrcp.f32 %v316_v12 }
 0x3ab   :  { %v338_v11 = vpack.c.bf16 %v333_v10, %v332_v9 }
 0x3ad   :  { %642 = vmatmul.msk.bf16.gmra.mxu3 %vm247_vm8, %v338_v11 }
 0x3b0   :  { %v736_v14 = vpop.eup %735 }
 0x3b1   :  { %v319_v13 = vpop.xlane.xlu0 %318  ;;  %v334_v16 = vmul.f32 %v736_v14, %v720_v40 }
 0x3b2   :  { %737 = vrcp.f32 %v319_v13 }
 0x3b8   :  { %v738_v15 = vpop.eup %737 }
 0x3b9   :  { %v335_v17 = vmul.f32 %v738_v15, %v722_v43 }
 0x3bb   :  { %v339_v19 = vpack.c.bf16 %v335_v17, %v334_v16 }
 0x3bd   :  { %643 = vmatmul.msk.bf16.gmra.mxu3 %vm247_vm8, %v339_v19  ;;  %v700_v19 = vld [vmem:[%s1047_s1 + $0x1] ss:$0 sm:$0xff]  ;;  %vm578_vm8 = vcmask 523264  }
 0x410   :  { %v362_v20 = vpop.f32.mrf.mxu3 }
 0x411   :  { %v382_v35 = vmul.f32 %v362_v20, %v920_v5 }
 0x418   :  { %v364_v21 = vpop.f32.mrf.mxu3 }
 0x419   :  { %v383_v36 = vmul.f32 %v364_v21, %v892_v61 }
 0x420   :  { %v367_v25 = vpop.f32.mrf.mxu3 }
 0x421   :  { %v384_v33 = vmul.f32 %v367_v25, %v885_v60 }
 0x423   :  { %v390_v39 = vadd.f32 %v384_v33, %v382_v35 }
 0x428   :  { %v369_v29 = vpop.f32.mrf.mxu3 }
 0x429   :  { %v385_v34 = vmul.f32 %v369_v29, %v925_v7  ;;  %v692_v29 = vld [vmem:[%s1050_s4 + $0x18] sm:$0xff] }
 0x42a   :  { %586 = vmatpush.bf16.msra.mxu0 %v692_v29 }
 0x42b   :  { %v391_v40 = vadd.f32 %v385_v34, %v383_v36  ;;  %v689_v36 = vld [vmem:[%s1050_s4] sm:$0xff] }
 0x430   :  { %v372_v30 = vpop.f32.mrf.mxu3 }
 0x431   :  { %v386_v37 = vmul.f32 %v372_v30, %v897_v62  ;;  %v691_v30 = vld [vmem:[%s1050_s4 + $0x10] sm:$0xff] }
 0x432   :  { %587 = vmatpush.bf16.msra.mxu0 %v691_v30 }
 0x433   :  { %v392_v43 = vadd.f32 %v390_v39, %v386_v37 }
 0x438   :  { %v374_v31 = vpop.f32.mrf.mxu3 }
 0x439   :  { %v387_v38 = vmul.f32 %v374_v31, %v930_v8  ;;  %v690_v31 = vld [vmem:[%s1050_s4 + $0x8] sm:$0xff]  ;;  %s780_s4 = smov [#allocation2]  }
 0x43a   :  { %588 = vmatpush.bf16.msra.mxu0 %v690_v31  ;;  %s604_s15 = sshll.u32 %s780_s4, 4  ;;  %s605_s15 = int_to_ptr.vmem [resolvable:$true] %s604_s15 }
 0x43b   :  { %v393_v44 = vadd.f32 %v391_v40, %v387_v38 }
 0x43e   :  { %589 = vmatpush.bf16.msra.mxu0 %v689_v36 }
 0x440   :  { %v377_v32 = vpop.f32.mrf.mxu3 }
 0x441   :  { %v388_v41 = vmul.f32 %v377_v32, %v906_v63 }
 0x443   :  { %v394_v60 = vadd.f32 %v392_v43, %v388_v41 }
 0x448   :  { %v379_v42 = vpop.f32.mrf.mxu3 }
 0x449   :  { %v389_v45 = vmul.f32 %v379_v42, %v913_v1 }
 0x44b   :  { %v395_v46 = vadd.f32 %v393_v44, %v389_v45 }
 0x44d   :  { %v400_v7 = vpack.c.bf16 %v395_v46, %v394_v60 }
 0x44f   :  { %652 = vmatmul.msk.bf16.vlgmr.msrb.gmra.mxu0 %vm34_vm0, %v400_v7 }
 0x4cc   :  { %v425_v5 = vpop.f32.mrf.mxu0 }
 0x4cd   :  { %v994_v61 = vadd.f32 %v425_v5, %v826_v0  ;;  %v659_v0 = vld [vmem:[%s1049_s3 + $0x10] sm:$0xf] }
 0x4ce   :  { %v660_v50 = vor.u32 %v688_v49, %v659_v0 }
 0x4cf   :  { %v432_v62 = vmul.f32 %v994_v61, %v994_v61 }
 0x4d0   :  { %487 = vmatpush.bf16.msrb.mxu1 %v660_v50 }
 0x4d1   :  { %v434_v8 = vsel %vm34_vm0, %v432_v62, 0.0 }
 0x4d2   :  { %435 = vadd.xlane.f32.xlu2 %v434_v8 }
 0x4d4   :  { %v427_v63 = vpop.f32.mrf.mxu0 }
 0x4d5   :  { %v1000_v47 = vadd.f32 %v427_v63, %v833_v2  ;;  %v655_v2 = vld [vmem:[%s1049_s3] sm:$0xf] }
 0x4d6   :  { %v656_v53 = vor.u32 %v686_v51, %v655_v2 }
 0x4d7   :  { %v433_v1 = vmul.f32 %v1000_v47, %v1000_v47 }
 0x4d8   :  { %488 = vmatpush.bf16.msrb.mxu1 %v656_v53 }
 0x4d9   :  { %v437_v48 = vsel %vm34_vm0, %v433_v1, 0.0 }
 0x4da   :  { %438 = vadd.xlane.f32.xlu1 %v437_v48 }
 0x545   :  { %v436_v52 = vpop.xlane.xlu2 %435 }
 0x546   :  { %v440_v54 = vmul.f32 %v436_v52, %v851_v18 }
 0x548   :  { %v442_v55 = vadd.f32 1e-06, %v440_v54 }
 0x54a   :  { %739 = vrsqrt.f32 %v442_v55  ;;  %vm450_vm10 = vweird.f32 %v442_v55 }
 0x54d   :  { %v439_v56 = vpop.xlane.xlu1 %438 }
 0x54e   :  { %v441_v57 = vmul.f32 %v439_v56, %v851_v18 }
 0x550   :  { %v740_v58 = vpop.eup %739  ;;  %v443_v59 = vadd.f32 1e-06, %v441_v57 }
 0x551   :  { %v445_v3 = vmul.f32 %v740_v58, %v442_v55  ;;  %vm451_vm9 = vweird.f32 %v740_v58 }
 0x552   :  { %741 = vrsqrt.f32 %v443_v59  ;;  %vm452_vm11 = vmor %vm450_vm10, %vm451_vm9  ;;  %vm460_vm13 = vweird.f32 %v443_v59 }
 0x553   :  { %v446_v4 = vmul.f32 %v740_v58, %v445_v3 }
 0x555   :  { %v447_v6 = vmul.f32 0.5, %v446_v4 }
 0x557   :  { %v448_v9 = vsub.f32 1.5, %v447_v6 }
 0x558   :  { %v742_v10 = vpop.eup %741 }
 0x559   :  { %v455_v11 = vmul.f32 %v742_v10, %v443_v59  ;;  %v449_v12 = vmul.f32 %v740_v58, %v448_v9  ;;  %vm461_vm12 = vweird.f32 %v742_v10 }
 0x55a   :  { %vm462_vm14 = vmor %vm460_vm13, %vm461_vm12 }
 0x55b   :  { %v456_v13 = vmul.f32 %v742_v10, %v455_v11  ;;  %v453_v15 = vsel %vm452_vm11, %v740_v58, %v449_v12 }
 0x55c   :  { %v464_v18 = vmul.f32 %v453_v15, %v994_v61 }
 0x55d   :  { %v457_v14 = vmul.f32 0.5, %v456_v13 }
 0x55e   :  { %v467_v22 = vmul.f32 %v700_v19, %v464_v18 }
 0x55f   :  { %v458_v16 = vsub.f32 1.5, %v457_v14 }
 0x561   :  { %v459_v17 = vmul.f32 %v742_v10, %v458_v16 }
 0x563   :  { %v463_v20 = vsel %vm462_vm14, %v742_v10, %v459_v17 }
 0x564   :  { %v465_v21 = vmul.f32 %v463_v20, %v1000_v47 }
 0x566   :  { %v468_v23 = vmul.f32 %v700_v19, %v465_v21 }
 0x568   :  { %v469_v24 = vpack.c.bf16 %v468_v23, %v467_v22 }
 0x56a   :  { %661 = vmatmul.msk.bf16.vlgmr.msrb.gmra.mxu1 %vm34_vm0, %v469_v24 }
 0x5e7   :  { %v490_v25 = vpop.f32.mrf.mxu1 }
 0x5e8   :  { %537 = vrot.lane.b32.xlu0 %v490_v25, %s778_s23  ;;  %v662_v27 = vmul.f32 -1.442695, %v490_v25 }
 0x5ea   :  { %743 = vpow2.f32 %v662_v27 }
 0x5ef   :  { %v492_v26 = vpop.f32.mrf.mxu1 }
 0x5f0   :  { %539 = vrot.lane.b32.xlu2 %v492_v26, %s778_s23  ;;  %v663_v28 = vmul.f32 -1.442695, %v492_v26  ;;  %v744_v32 = vpop.eup %743 }
 0x5f1   :  { %v501_v34 = vadd.f32 1.0, %v744_v32 }
 0x5f2   :  { %745 = vpow2.f32 %v663_v28 }
 0x5f3   :  { %747 = vrcp.f32 %v501_v34  ;;  %vm508_vm2 = vweird.f32 %v501_v34  ;;  %v514_v7 = vand.u32 2147483648, %v501_v34  ;;  %v512_v62 = vand.u32 2147483647, %v501_v34 }
 0x5f5   :  { %v515_v48 = vor.u32 1.1754944e-38, %v514_v7  ;;  %vm513_vm7 = vcmp.eq.f32.partialorder %v512_v62, 8.507059e+37 }
 0x5f8   :  { %v746_v33 = vpop.eup %745 }
 0x5f9   :  { %v502_v35 = vadd.f32 1.0, %v746_v33  ;;  %v748_v37 = vpop.eup %747 }
 0x5fa   :  { %v504_v40 = vmul.f32 %v748_v37, %v501_v34  ;;  %vm509_vm15 = vweird.f32 %v748_v37 }
 0x5fb   :  { %749 = vrcp.f32 %v502_v35  ;;  %v529_v46 = vand.u32 2147483648, %v502_v35  ;;  %vm523_vm3 = vweird.f32 %v502_v35  ;;  %v527_v5 = vand.u32 2147483647, %v502_v35  ;;  %vm510_vm4 = vmor %vm508_vm2, %vm509_vm15 }
 0x5fc   :  { %v505_v42 = vsub.f32 1.0, %v504_v40 }
 0x5fd   :  { %v530_v1 = vor.u32 1.1754944e-38, %v529_v46  ;;  %vm528_vm6 = vcmp.eq.f32.partialorder %v527_v5, 8.507059e+37 }
 0x5fe   :  { %v506_v44 = vmul.f32 %v748_v37, %v505_v42 }
 0x600   :  { %v507_v60 = vadd.f32 %v748_v37, %v506_v44 }
 0x601   :  { %v750_v38 = vpop.eup %749 }
 0x602   :  { %v519_v39 = vmul.f32 %v750_v38, %v502_v35  ;;  %vm524_vm1 = vweird.f32 %v750_v38  ;;  %v511_v63 = vsel %vm510_vm4, %v748_v37, %v507_v60 }
 0x603   :  { %vm525_vm5 = vmor %vm523_vm3, %vm524_vm1  ;;  %v516_v49 = vsel %vm513_vm7, %v515_v48, %v511_v63 }
 0x604   :  { %v520_v41 = vsub.f32 1.0, %v519_v39  ;;  %v533_v51 = vmul.f32 %v516_v49, %v490_v25 }
 0x606   :  { %v521_v43 = vmul.f32 %v750_v38, %v520_v41 }
 0x608   :  { %v522_v45 = vadd.f32 %v750_v38, %v521_v43 }
 0x60a   :  { %v526_v8 = vsel %vm525_vm5, %v750_v38, %v522_v45 }
 0x60b   :  { %v531_v0 = vsel %vm528_vm6, %v530_v1, %v526_v8 }
 0x60c   :  { %v534_v2 = vmul.f32 %v531_v0, %v492_v26 }
 0x64a   :  { %v540_v50 = vpop.permute.xlu2 %539 }
 0x64b   :  { %v544_v53 = vmul.f32 %v540_v50, %v534_v2 }
 0x65a   :  { %v538_v52 = vpop.permute.xlu0 %537 }
 0x65b   :  { %v543_v54 = vmul.f32 %v538_v52, %v533_v51 }
 0x65d   :  { %v545_v55 = vpack.c.bf16 %v544_v53, %v543_v54 }
 0x65f   :  { %680 = vmatmul.msk.bf16.vlgmr.msra.gmra.mxu0 %vm578_vm8, %v545_v55 }
 0x6dc   :  { %v591_v56 = vpop.f32.mrf.mxu0 }
 0x6dd   :  { %v596_v57 = vadd.f32 %v591_v56, %v994_v61 }
 0x6df   :  { %598 = vst.msk [vmem:[#allocation2] sm:$0xff] %vm34_vm0, %v596_v57 }
 0x6e4   :  { %v593_v58 = vpop.f32.mrf.mxu0 }
 0x6e5   :  { %v597_v59 = vadd.f32 %v593_v58, %v1000_v47 }
 0x6e7   :  { %599 = vst.msk [vmem:[#allocation2 + $0x8] sm:$0xff] %vm34_vm0, %v597_v59 }
 0x6e8   :  { %612 = dma.vmem_to_hbm [thread:$0]  %s605_s15, 256, %s607_s6, [#allocation3], %s781_s18, %s781_s18, %s782_s19  }
 0x6e9   :  { %775 = dma.done.wait [#allocation3], 256  }
 0x6ea   :  { %776 = vsyncadd [#allocation3], 4294967040 }
 0x6eb   :  { %617 = vsyncpa [#allocation3], 1 }

</bundles_post_ra>
